<compile_context>
chip_gen: v5e
topology: v5e:2x2
jax: 0.10.0
libtpu: 0.0.40
codegen_flags: <defaults>
</compile_context>

<pallas_src>
import functools

import jax
import jax.numpy as jnp
from jax.experimental import pallas as pl
from jax.experimental.pallas import tpu as pltpu


def _actnorm_kernel(x_ref, log_scale_ref, bias_ref, o_ref):
    # x_ref/o_ref: (TM, TW) lane-dense tile; log_scale_ref/bias_ref: (TM, 1) f32.
    # exp goes to the EUP slot (idle in this mem-bound kernel -> free); the
    # multiply-add runs in f32 and casts once on store.
    scale = jnp.exp(log_scale_ref[...])
    x = x_ref[...].astype(jnp.float32)
    o_ref[...] = (x * scale + bias_ref[...]).astype(o_ref.dtype)


def _choose_tile(dim, align, target):
    """Tile along one axis: the full dim if it fits `target`, otherwise the
    largest multiple of `align` <= target (the ragged last block is handled by
    pl.cdiv + Pallas partial-tile masking)."""
    if dim <= target:
        return int(dim)
    return int(max(align, (target // align) * align))


def _device_defaults():
    """(target_tile_bytes, vmem_limit_bytes) per TPU generation."""
    try:
        kind = jax.devices()[0].device_kind.lower()
    except Exception:  # pragma: no cover - defensive, defaults are safe anywhere
        kind = ""
    if "v5 lite" in kind or "v5e" in kind or "v5lite" in kind:
        # v5e: ~0.8 TB/s HBM, per-step overhead already small at 2 MiB tiles;
        # explicit limit overrides the 16 MiB scoped default.
        return 2 * 1024 * 1024, 32 * 1024 * 1024
    if "v7" in kind:
        # v7x: 3.2 TB/s HBM -> bigger tiles to amortize per-step cost; stay
        # comfortably inside the 64 MiB physical VMEM (double-buffered x+out
        # at 6 MiB tiles ~ 24 MiB + small param blocks).
        return 6 * 1024 * 1024, 48 * 1024 * 1024
    # v6e and anything else.
    return 4 * 1024 * 1024, 32 * 1024 * 1024


@functools.partial(jax.jit, static_argnames=("target_tile_bytes", "vmem_limit_bytes"))
def _actnorm_impl(x, log_scale, bias, *, target_tile_bytes, vmem_limit_bytes):
    N, C, H, W = x.shape
    rows, cols = N * C, H * W
    itemsize = jnp.dtype(x.dtype).itemsize

    # Lane-dense flattening: NCHW -> (N*C, H*W) (free for contiguous NCHW).
    x2 = x.reshape(rows, cols)

    # Per-row params in f32: row r = n*C + c -> channel c.  exp is done in-kernel.
    log_scale_rows = jnp.tile(log_scale.astype(jnp.float32).reshape(C), N).reshape(rows, 1)
    bias_rows = jnp.tile(bias.astype(jnp.float32).reshape(C), N).reshape(rows, 1)

    # Dtype-aware sublane alignment: bf16 packs 2 rows per sublane, int8/fp8 4.
    row_align = 8 * max(1, 4 // itemsize)

    # Lane dim as wide as the budget allows (multiple of 128), then fill the
    # sublane dim; cap tm so the lane-padded (TM,1) param blocks stay small.
    tw = _choose_tile(cols, 128, max(128, target_tile_bytes // (row_align * itemsize)))
    tm = _choose_tile(rows, row_align,
                      min(1024, max(row_align, target_tile_bytes // (tw * itemsize))))

    # v7x megacore: make sure a parallel axis has >= 2 steps when possible so
    # both TensorCores stream (no effect on v5e/v6e, 1 TC per chip).
    if pl.cdiv(rows, tm) * pl.cdiv(cols, tw) < 2:
        if rows >= 2 * row_align:
            tm = max(row_align, (pl.cdiv(rows, 2) // row_align) * row_align)
        elif cols >= 2 * 128:
            tw = max(128, (pl.cdiv(cols, 2) // 128) * 128)

    # Grid: column axis innermost so the (TM,1) param blocks are fetched once
    # per row tile (Pallas skips re-DMA when a block index is unchanged between
    # consecutive steps) -- do not reorder these axes.
    grid = (pl.cdiv(rows, tm), pl.cdiv(cols, tw))

    x_spec = pl.BlockSpec((tm, tw), lambda i, j: (i, j))
    p_spec = pl.BlockSpec((tm, 1), lambda i, j: (i, 0))
    out_spec = pl.BlockSpec((tm, tw), lambda i, j: (i, j))

    out2 = pl.pallas_call(
        _actnorm_kernel,
        out_shape=jax.ShapeDtypeStruct((rows, cols), x.dtype),
        grid_spec=pltpu.PrefetchScalarGridSpec(
            num_scalar_prefetch=0,
            grid=grid,
            in_specs=[x_spec, p_spec, p_spec],
            out_specs=out_spec,
        ),
        compiler_params=pltpu.CompilerParams(
            dimension_semantics=("parallel", "parallel"),
            vmem_limit_bytes=vmem_limit_bytes,
        ),
    )(x2, log_scale_rows, bias_rows)

    return out2.reshape(N, C, H, W)


def actnorm_forward(x, log_scale, bias, *, target_tile_bytes=None, vmem_limit_bytes=None):
    """ActNorm forward: y = x * exp(log_scale) + bias.

    x: (N, C, H, W); log_scale, bias: (1, C, 1, 1).
    """
    N, C, H, W = x.shape
    assert log_scale.shape == (1, C, 1, 1)
    assert bias.shape == (1, C, 1, 1)
    dflt_tile, dflt_vmem = _device_defaults()
    return _actnorm_impl(
        x, log_scale, bias,
        target_tile_bytes=int(target_tile_bytes or dflt_tile),
        vmem_limit_bytes=int(vmem_limit_bytes or dflt_vmem),
    )


if __name__ == "__main__":
    key = jax.random.PRNGKey(0)
    kx, ks, kb = jax.random.split(key, 3)

    # Small shape consistent with the module (after SqueezeLayer: C multiple of 4).
    N, C, H, W = 2, 4, 16, 16
    x = jax.random.normal(kx, (N, C, H, W), dtype=jnp.float32)
    # PyTorch __init__ zero-initializes the params; use small non-zero values
    # so the exp/scale path is actually exercised.
    log_scale = 0.1 * jax.random.normal(ks, (1, C, 1, 1), dtype=jnp.float32)
    bias = 0.1 * jax.random.normal(kb, (1, C, 1, 1), dtype=jnp.float32)

    y = jax.block_until_ready(actnorm_forward(x, log_scale, bias))
    y_ref = x * jnp.exp(log_scale) + bias
    assert y.shape == (N, C, H, W)
    assert jnp.allclose(y, y_ref, atol=1e-5, rtol=1e-5)

    # Multi-tile grids with small tile budgets, including ragged last blocks
    # (rows / cols not multiples of the tile) and a bf16 case exercising the
    # dtype-aware sublane alignment.
    cases = [
        ((2, 8, 32, 64), jnp.float32, 64 * 1024),   # row-tiled
        ((2, 4, 64, 64), jnp.float32, 64 * 1024),   # column-tiled
        ((2, 7, 24, 36), jnp.float32, 16 * 1024),   # ragged row & column tiles
        ((2, 8, 16, 32), jnp.bfloat16, 8 * 1024),   # bf16: 16-row sublane align
    ]
    for idx, (shape, dtype, tile_bytes) in enumerate(cases):
        k1, k2, k3 = jax.random.split(jax.random.PRNGKey(idx + 1), 3)
        N2, C2, H2, W2 = shape
        x2 = jax.random.normal(k1, shape, dtype=jnp.float32).astype(dtype)
        ls2 = 0.1 * jax.random.normal(k2, (1, C2, 1, 1), dtype=jnp.float32)
        b2 = 0.1 * jax.random.normal(k3, (1, C2, 1, 1), dtype=jnp.float32)
        y2 = jax.block_until_ready(
            actnorm_forward(x2, ls2, b2, target_tile_bytes=tile_bytes))
        y2_ref = (x2.astype(jnp.float32) * jnp.exp(ls2) + b2).astype(dtype)
        tol = 1e-5 if dtype == jnp.float32 else 2e-2
        assert y2.shape == shape
        assert jnp.allclose(y2.astype(jnp.float32), y2_ref.astype(jnp.float32),
                            atol=tol, rtol=tol)

    print("KERNEL_OK")
</pallas_src>

<mosaic_0001>
module attributes {stable_mosaic.version = 11 : i64} {
  func.func @_actnorm_kernel(%arg0: i32, %arg1: i32, %arg2: memref<8x128xf32, #tpu.memory_space<vmem>>, %arg3: memref<8x1xf32, #tpu.memory_space<vmem>>, %arg4: memref<8x1xf32, #tpu.memory_space<vmem>>, %arg5: memref<8x128xf32, #tpu.memory_space<vmem>>) attributes {dimension_semantics = [#tpu.dimension_semantics<parallel>, #tpu.dimension_semantics<parallel>], iteration_bounds = array<i64: 1, 2>, scalar_prefetch = 0 : i64, scratch_operands = 0 : i64, tpu.core_type = #tpu.core_type<tc>, window_params = [{transform_indices = @transform_0, window_bounds = array<i64: 8, 128>}, {transform_indices = @transform_1, window_bounds = array<i64: 8, 1>}, {transform_indices = @transform_2, window_bounds = array<i64: 8, 1>}, {transform_indices = @transform_3, window_bounds = array<i64: 8, 128>}]} {
    %c0 = arith.constant 0 : index
    %c0_0 = arith.constant 0 : index
    %0 = vector.load %arg3[%c0, %c0_0] : memref<8x1xf32, #tpu.memory_space<vmem>>, vector<8x1xf32>
    %1 = math.exp %0 : vector<8x1xf32>
    %c0_1 = arith.constant 0 : index
    %c0_2 = arith.constant 0 : index
    %2 = vector.load %arg2[%c0_1, %c0_2] : memref<8x128xf32, #tpu.memory_space<vmem>>, vector<8x128xf32>
    %3 = vector.broadcast %1 : vector<8x1xf32> to vector<8x128xf32>
    %4 = arith.mulf %2, %3 : vector<8x128xf32>
    %c0_3 = arith.constant 0 : index
    %c0_4 = arith.constant 0 : index
    %5 = vector.load %arg4[%c0_3, %c0_4] : memref<8x1xf32, #tpu.memory_space<vmem>>, vector<8x1xf32>
    %6 = vector.broadcast %5 : vector<8x1xf32> to vector<8x128xf32>
    %7 = arith.addf %4, %6 : vector<8x128xf32>
    %c0_5 = arith.constant 0 : index
    %c0_6 = arith.constant 0 : index
    %8 = vector.load %arg5[%c0_5, %c0_6] : memref<8x128xf32, #tpu.memory_space<vmem>>, vector<8x128xf32>
    tpu.vector_store %arg5[%c0_5, %c0_6], %7 {strides = array<i32>} : memref<8x128xf32, #tpu.memory_space<vmem>>, vector<8x128xf32>,
    return
  }
  func.func @transform_0(%arg0: i32, %arg1: i32) -> (i32, i32) {
    %c0_i32 = arith.constant 0 : i32
    return %arg0, %arg1 : i32, i32
  }
  func.func @transform_1(%arg0: i32, %arg1: i32) -> (i32, i32) {
    %c0_i32 = arith.constant 0 : i32
    %c0_i32_0 = arith.constant 0 : i32
    return %arg0, %c0_i32 : i32, i32
  }
  func.func @transform_2(%arg0: i32, %arg1: i32) -> (i32, i32) {
    %c0_i32 = arith.constant 0 : i32
    %c0_i32_0 = arith.constant 0 : i32
    return %arg0, %c0_i32 : i32, i32
  }
  func.func @transform_3(%arg0: i32, %arg1: i32) -> (i32, i32) {
    %c0_i32 = arith.constant 0 : i32
    return %arg0, %arg1 : i32, i32
  }
}

</mosaic_0001>

<bundles_post_ra>
// kernel: tile.1
= control target key start
LH: loop header
LB: loop body
LE: loop exit
PB: predicated region body
PF: predicated region fallthrough
CT: control target
= control target key end

     0   :  { %s34_s8 = smov 125   ;;  %s35_s9 = smov 126   ;;  %vm7_vm0 = vcmask 7168   ;;  %s61_s0 = inlined_call_operand.vmem [shape: f32[2,4], index: 0, kind: input, shape index: {}]   ;;  %s62_s1 = inlined_call_operand.vmem [shape: f32[8,1], index: 1, kind: output, shape index: {}]  }
   0x1   :  { %v4_v0 = vld [vmem:[%s61_s0] sm:$0x3]  ;;  %s33_s0 = smov 127  }
   0x2   :  { %5 = vst [vmem:[#allocation0] sm:$0x3] %v4_v0 }
   0x9   :  { %v9_v1 = vld [vmem:[#allocation0] sm:$0x3]  }
   0xa   :  { %v21_v2 = vld [vmem:[#allocation0] sm:$0x3]   ;;  %10 = vrot.lane.b32.xlu0 %v9_v1, %s33_s0 }
   0xb   :  { %22 = vrot.lane.b32.xlu1 %v21_v2, %s34_s8  ;;  %v15_v3 = vld [vmem:[#allocation0] sm:$0x3]  }
   0xc   :  { %v6_v4 = vld [vmem:[#allocation0] sm:$0x3]  }
   0xd   :  { %8 = vst.msk [vmem:[%s62_s1] ss:$4 sm:$0x3] %vm7_vm0, %v6_v4  }
  0x12   :  { %16 = vrot.lane.b32.xlu0 %v15_v3, %s35_s9 }
  0x7c   :  { %v11_v5 = vpop.permute.xlu0 %10  }
  0x7d   :  { %v23_v6 = vpop.permute.xlu1 %22   ;;  %27 = vst.msk [vmem:[%s62_s1 + $0x1] ss:$4 sm:$0x3] %vm7_vm0, %v11_v5  }
  0x7e   :  { %29 = vst.msk [vmem:[%s62_s1 + $0x3] ss:$4 sm:$0x3] %vm7_vm0, %v23_v6  }
  0x84   :  { %v17_v7 = vpop.permute.xlu0 %16  }
  0x85   :  { %28 = vst.msk [vmem:[%s62_s1 + $0x2] ss:$4 sm:$0x3] %vm7_vm0, %v17_v7  }

// kernel: tile.10
= control target key start
LH: loop header
LB: loop body
LE: loop exit
PB: predicated region body
PF: predicated region fallthrough
CT: control target
= control target key end

     0   :  { %s22_s0 = inlined_call_operand.vmem [shape: f32[4], index: 0, kind: input, shape index: {}]   ;;  %s23_s1 = inlined_call_operand.vmem [shape: f32[2,4], index: 1, kind: output, shape index: {}]  }
   0x1   :  { %v4_v0 = vld [vmem:[%s22_s0] ss:$0 sm:$0xff] }
   0x2   :  { %5 = vst [vmem:[%s23_s1] sm:$0x3] %v4_v0 }

// kernel: _actnorm_impl.1
= control target key start
LH: loop header
LB: loop body
LE: loop exit
PB: predicated region body
PF: predicated region fallthrough
CT: control target
= control target key end

     0   :  { %s452_s12 = smov 0   ;;  %s454_s13 = smov 0   ;;  %s488_s0 = inlined_call_operand.vmem [shape: f32[8,256], index: 0, kind: input, shape index: {}]   ;;  %s489_s1 = inlined_call_operand.vmem [shape: f32[8,1], index: 1, kind: input, shape index: {}]   ;;  %s490_s2 = inlined_call_operand.vmem [shape: f32[8,1], index: 2, kind: input, shape index: {}]   ;;  %s491_s3 = inlined_call_operand.vmem [shape: f32[8,256], index: 3, kind: output, shape index: {}]  }
   0x1   :  { %s456_s14 = smov 0  }
   0x2 LB: > { %s22_s15 = sadd.s32 1, %s425_s13  ;;  %p374_p0 = scmp.ge.s32.totalorder %s429_s14, 1  ;;  %s429_s14 = sphi %s456_s14, %s13_s14   ;;  %s425_s13 = sphi %s454_s13, %s493_s13   ;;  %s421_s12 = sphi %s452_s12, %s492_s12  }
   0x3   : > { %p23_p1 = scmp.ge.s32.totalorder %s22_s15, 2  ;;  %p174_p2 = scmp.lt.s32.totalorder %s429_s14, 3 }
   0x5   : > { %s495_s15 = smov (%p23_p1, %s22_s15), 0  ;;  %p175_p3 = pnand %p374_p0, %p174_p2 }
   0x6   : > { %p214_p4 = scmp.lt.s32.totalorder (!%p175_p3), %s421_s12, 1 }
   0x7   : > { %178 = sbr.rel (%p175_p3) target bundleno = 148 (0x94), region = 32 }
   0xc   : > { %v236_v0 = vld [vmem:[%s489_s1] sm:$0xff]  ;;  %v431_v1 = vmov 0   ;;  %s497_s12 = smov (!%p214_p4, %s421_s12), 1 }
   0xd   : > { %404 = vset.pattern.permute.xlu0 %v431_v1  ;;  %v237_v2 = vmul.f32 1.442695, %v236_v0  ;;  %v246_v4 = vld [vmem:[%s490_s2] sm:$0xff]  ;;  %s375_s20 = sshll.u32 %s497_s12, 3 }
   0xe   : > { %s219_s23 = scalar_lea.vmem %s488_s0, %s375_s20  ;;  %s235_s26 = scalar_lea.vmem %s491_s3, %s375_s20 }
   0xf   : > { %405 = vpow2.f32 %v237_v2  ;;  %v239_v6 = vld [vmem:[%s219_s23] sm:$0xff] }
  0x15   : > { %v406_v3 = vpop.eup %405 }
  0x16   : > { %242 = vperm.xlu0 %404, %v406_v3  }
  0x1e   : > { %249 = vperm.xlu0 %404, %v246_v4  }
  0x88   : > { %v243_v5 = vpop.permute.xlu0 %242 }
  0x89   : > { %v245_v7 = vmul.f32 %v243_v5, %v239_v6 }
  0x90   : > { %v250_v8 = vpop.permute.xlu0 %249 }
  0x91   : > { %v252_v9 = vadd.f32 %v250_v8, %v245_v7 }
  0x93   : > { %253 = vst [vmem:[%s235_s26] sm:$0xff] %v252_v9 }
  0x94 PF: > { %s13_s14 = sadd.s32 1, %s429_s14   ;;  %s492_s12 = smov %s425_s13 }
  0x95   : > { %p10_p5 = scmp.ge.s32.totalorder %s13_s14, 4   ;;  %s493_s13 = smov %s495_s15 }
  0x97   :  { %12 = sbr.rel (!%p10_p5) target bundleno = 2 (0x2), region = 68 }

</bundles_post_ra>
